<compile_context>
chip_gen: v5e
topology: v5e:2x2
jax: 0.10.0
libtpu: 0.0.40
codegen_flags: <defaults>
</compile_context>

<pallas_src>
import functools

import jax
import jax.numpy as jnp
from jax.experimental import pallas as pl
from jax.experimental.pallas import tpu as pltpu


def _round_up(x: int, m: int) -> int:
    return ((x + m - 1) // m) * m


def _vmem_budget_bytes() -> int:
    """Per-core VMEM budget for pallas_call, keyed on the actual chip generation."""
    try:
        cap = int(pltpu.get_tpu_info().vmem_capacity_bytes)
    except Exception:
        cap = 64 * 1024 * 1024  # conservative (v7x-sized) fallback
    # ~3/4 of physical VMEM, capped at 96 MiB: -> ~96 MiB on v5e/v6e, ~48 MiB on v7x.
    return max(32 * 1024 * 1024, min((cap * 3) // 4, 96 * 1024 * 1024))


def _interp_weight_matrix(out_size: int, in_size: int) -> jnp.ndarray:
    """Row-stochastic (out_size, in_size) bilinear weight matrix, align_corners=True."""
    if out_size == 1:
        src = jnp.zeros((1,), jnp.float32)
    else:
        src = jnp.arange(out_size, dtype=jnp.float32) * ((in_size - 1) / (out_size - 1))
    lo = jnp.clip(jnp.floor(src).astype(jnp.int32), 0, in_size - 1)
    hi = jnp.clip(lo + 1, 0, in_size - 1)
    frac = src - lo.astype(jnp.float32)
    rows = jnp.arange(out_size)
    w = jnp.zeros((out_size, in_size), jnp.float32)
    w = w.at[rows, lo].add(1.0 - frac)
    w = w.at[rows, hi].add(frac)
    return w


# ---------------------------------------------------------------------------
# Kernels
# ---------------------------------------------------------------------------

def _matmul_resident_rhs_kernel(a_ref, w_ref, o_ref):
    """One MXU matmul per grid step; the RHS block has a constant block index so it
    stays resident in VMEM.  No K-reduction axis, no f32 accumulator scratch:
    the dot result is written straight to the output tile."""
    o_ref[...] = jnp.dot(
        a_ref[...], w_ref[...], preferred_element_type=jnp.float32
    ).astype(o_ref.dtype)


def _matmul_tiled_kernel(a_ref, w_ref, o_ref, acc_ref):
    """General K-tiled matmul with f32 accumulator (used only when the RHS is too
    large to keep resident in VMEM)."""
    @pl.when(pl.program_id(2) == 0)
    def _():
        acc_ref[...] = jnp.zeros_like(acc_ref)

    acc_ref[...] += jnp.dot(a_ref[...], w_ref[...], preferred_element_type=jnp.float32)

    @pl.when(pl.program_id(2) == pl.num_programs(2) - 1)
    def _():
        o_ref[...] = acc_ref[...].astype(o_ref.dtype)


# ---------------------------------------------------------------------------
# Matmul dispatcher
# ---------------------------------------------------------------------------

def _pick_tm(m: int, cap: int = 512) -> int:
    """Largest M tile <= cap (multiple of 16) that minimizes padded rows."""
    tiles = -(-m // cap)                      # ceil(m / cap)
    return min(cap, _round_up(-(-m // tiles), 16))


def _pallas_matmul(a: jnp.ndarray, w: jnp.ndarray, out_dtype) -> jnp.ndarray:
    """(M, K) @ (K, N) -> (M, N) in out_dtype, accumulated in f32 on the MXU."""
    m, k = a.shape
    kw, n = w.shape
    assert k == kw
    budget = _vmem_budget_bytes()
    op_bytes = jnp.dtype(a.dtype).itemsize
    out_bytes = jnp.dtype(out_dtype).itemsize

    k_p = _round_up(k, 128)
    n_p = _round_up(n, 128)

    rhs_resident = 2 * k_p * n_p * op_bytes <= budget // 4

    if rhs_resident:
        # ---- resident-RHS path: single K block, weights DMA'd once --------------
        tm = _pick_tm(m)
        while tm > 16 and (2 * tm * k_p * op_bytes + 2 * tm * n_p * out_bytes
                           + 2 * k_p * n_p * op_bytes) > budget:
            tm = max(16, _round_up(tm // 2, 16))
        m_p = _round_up(m, tm)
        m_tiles = m_p // tm
        # v7x megacore: with a single M tile, split N in two so both TCs get work.
        if m_tiles == 1 and n_p >= 256 and n_p % 256 == 0:
            tn = n_p // 2
        else:
            tn = n_p
        n_tiles = n_p // tn

        a_p = a if (m_p == m and k_p == k) else jnp.pad(a, ((0, m_p - m), (0, k_p - k)))
        w_p = w if (k_p == k and n_p == n) else jnp.pad(w, ((0, k_p - k), (0, n_p - n)))

        cost = pl.CostEstimate(
            flops=2 * m_p * k_p * n_p,
            transcendentals=0,
            bytes_accessed=m_p * k_p * op_bytes + k_p * n_p * op_bytes
            + m_p * n_p * out_bytes,
        )
        out = pl.pallas_call(
            _matmul_resident_rhs_kernel,
            out_shape=jax.ShapeDtypeStruct((m_p, n_p), out_dtype),
            grid_spec=pltpu.PrefetchScalarGridSpec(
                num_scalar_prefetch=0,
                grid=(m_tiles, n_tiles),
                in_specs=[
                    pl.BlockSpec((tm, k_p), lambda i, j: (i, 0)),
                    pl.BlockSpec((k_p, tn), lambda i, j: (0, j)),
                ],
                out_specs=pl.BlockSpec((tm, tn), lambda i, j: (i, j)),
            ),
            compiler_params=pltpu.CompilerParams(
                dimension_semantics=("parallel", "parallel"),
                vmem_limit_bytes=budget,
            ),
            cost_estimate=cost,
        )(a_p, w_p)
    else:
        # ---- general K-tiled fallback (very large weight matrices only) ---------
        cap = 2048 if budget >= 80 * 1024 * 1024 else 1024   # v5e/v6e vs v7x
        tk = min(_round_up(k, 128), cap)
        tn = min(_round_up(n, 128), cap)
        tm = _pick_tm(m)

        def _ws(tm_, tk_, tn_):
            return (2 * tm_ * tk_ * op_bytes + 2 * tk_ * tn_ * op_bytes
                    + 2 * tm_ * tn_ * out_bytes + tm_ * tn_ * 4)

        while tm > 16 and _ws(tm, tk, tn) > budget:
            tm = max(16, _round_up(tm // 2, 16))
        while _ws(tm, tk, tn) > budget and (tk > 128 or tn > 128):
            if tn >= tk and tn > 128:
                tn = max(128, (tn // 2) // 128 * 128)
            elif tk > 128:
                tk = max(128, (tk // 2) // 128 * 128)

        m_p, k_p, n_p = _round_up(m, tm), _round_up(k, tk), _round_up(n, tn)
        a_p = a if (m_p == m and k_p == k) else jnp.pad(a, ((0, m_p - m), (0, k_p - k)))
        w_p = w if (k_p == k and n_p == n) else jnp.pad(w, ((0, k_p - k), (0, n_p - n)))

        cost = pl.CostEstimate(
            flops=2 * m_p * k_p * n_p,
            transcendentals=0,
            bytes_accessed=(n_p // tn) * m_p * k_p * op_bytes
            + (m_p // tm) * k_p * n_p * op_bytes + m_p * n_p * out_bytes,
        )
        out = pl.pallas_call(
            _matmul_tiled_kernel,
            out_shape=jax.ShapeDtypeStruct((m_p, n_p), out_dtype),
            grid_spec=pltpu.PrefetchScalarGridSpec(
                num_scalar_prefetch=0,
                grid=(m_p // tm, n_p // tn, k_p // tk),
                in_specs=[
                    pl.BlockSpec((tm, tk), lambda i, j, kk: (i, kk)),
                    pl.BlockSpec((tk, tn), lambda i, j, kk: (kk, j)),
                ],
                out_specs=pl.BlockSpec((tm, tn), lambda i, j, kk: (i, j)),
                scratch_shapes=[pltpu.VMEM((tm, tn), jnp.float32)],
            ),
            compiler_params=pltpu.CompilerParams(
                dimension_semantics=("parallel", "parallel", "arbitrary"),
                vmem_limit_bytes=budget,
            ),
            cost_estimate=cost,
        )(a_p, w_p)

    if m_p != m or n_p != n:
        out = out[:m, :n]
    return out


# ---------------------------------------------------------------------------
# Bilinear resize
# ---------------------------------------------------------------------------

_KRON_MAX_ELEMS = 1 << 20  # Kronecker weight (H_in*W_in x H_out*W_out) <= ~2 MiB bf16


@functools.partial(jax.jit, static_argnames=("size",))
def interpolate_bilinear_align_corners(x_nchw: jnp.ndarray, size):
    """Equivalent of F.interpolate(x, size=size, mode='bilinear', align_corners=True)."""
    if x_nchw.ndim != 4:
        raise ValueError("expected NCHW input")
    if not jnp.issubdtype(x_nchw.dtype, jnp.floating):
        # PyTorch's bilinear interpolate rejects integer inputs as well.
        raise TypeError("bilinear interpolation requires a floating-point input")

    n, c, h_in, w_in = x_nchw.shape
    h_out, w_out = size

    # bf16 operands (MXU-native on all TPU generations); accumulation is f32 in-kernel.
    op_dtype = jnp.bfloat16

    wh = _interp_weight_matrix(h_out, h_in)   # (H_out, H_in), f32
    ww = _interp_weight_matrix(w_out, w_in)   # (W_out, W_in), f32

    nc = n * c
    kdim = h_in * w_in
    ndim = h_out * w_out

    if kdim * ndim <= _KRON_MAX_ELEMS:
        # Tiny spatial sizes: fold both resizes into one lane-dense Kronecker matmul;
        # KT stays resident in VMEM and is fetched from HBM exactly once.
        kt = jnp.kron(wh, ww).T.astype(op_dtype)          # (H_in*W_in, H_out*W_out)
        x_flat = x_nchw.reshape(nc, kdim).astype(op_dtype)
        out_flat = _pallas_matmul(x_flat, kt, out_dtype=x_nchw.dtype)
        return out_flat.reshape(n, c, h_out, w_out)

    # Image-scale sizes: separable two-matmul form (~4 taps per output instead of
    # H_in*W_in MACs; weights are (W_in x W_out) and (H_in x H_out) only).
    a1 = x_nchw.reshape(nc * h_in, w_in).astype(op_dtype)
    t1 = _pallas_matmul(a1, ww.T.astype(op_dtype), out_dtype=op_dtype)   # (nc*H_in, W_out)
    # TODO(synk): fuse these two HBM transpose passes into the kernels (transposed
    # out_spec / in-kernel XLU transpose) instead of paying them as XLA copies.
    a2 = t1.reshape(nc, h_in, w_out).transpose(0, 2, 1).reshape(nc * w_out, h_in)
    t2 = _pallas_matmul(a2, wh.T.astype(op_dtype), out_dtype=x_nchw.dtype)  # (nc*W_out, H_out)
    return t2.reshape(nc, w_out, h_out).transpose(0, 2, 1).reshape(n, c, h_out, w_out)


class Interpolate:
    """JAX/Pallas port of model/ReferCam.py::Interpolate (no learnable params)."""

    def __init__(self, size, mode="bilinear"):
        assert mode == "bilinear", "only bilinear mode is implemented"
        if isinstance(size, int):
            size = (size, size)
        self.size = tuple(size)
        self.mode = mode

    def __call__(self, x):
        return interpolate_bilinear_align_corners(x, self.size)


if __name__ == "__main__":
    key = jax.random.PRNGKey(0)

    # 1) Small shapes consistent with the module's usage (Kronecker / resident path).
    x = jax.random.normal(key, (2, 4, 16, 16), dtype=jnp.float32)
    module = Interpolate(size=(32, 32), mode="bilinear")
    y = jax.block_until_ready(module(x))
    assert y.shape == (2, 4, 32, 32)

    wh = _interp_weight_matrix(32, 16)
    ww = _interp_weight_matrix(32, 16)
    y_ref = jnp.einsum("oh,nchw,pw->ncop", wh, x, ww)
    # bf16 operands (f32 accumulation) -> ~1e-3 relative error; tolerance loosened.
    assert jnp.allclose(y, y_ref, atol=5e-2, rtol=5e-2), float(jnp.max(jnp.abs(y - y_ref)))

    # 2) Exercise the separable (image-scale) path as well.
    x2 = jax.random.normal(jax.random.PRNGKey(1), (2, 4, 48, 48), dtype=jnp.float32)
    y2 = jax.block_until_ready(Interpolate(size=(96, 96))(x2))
    assert y2.shape == (2, 4, 96, 96)
    wh2 = _interp_weight_matrix(96, 48)
    ww2 = _interp_weight_matrix(96, 48)
    y2_ref = jnp.einsum("oh,nchw,pw->ncop", wh2, x2, ww2)
    assert jnp.allclose(y2, y2_ref, atol=5e-2, rtol=5e-2), float(jnp.max(jnp.abs(y2 - y2_ref)))

    print("KERNEL_OK")
</pallas_src>

<mosaic_0001>
module attributes {stable_mosaic.version = 11 : i64} {
  func.func @_matmul_resident_rhs_kernel(%arg0: i32, %arg1: i32, %arg2: memref<16x256xbf16, #tpu.memory_space<vmem>>, %arg3: memref<256x512xbf16, #tpu.memory_space<vmem>>, %arg4: memref<16x512xf32, #tpu.memory_space<vmem>>) attributes {dimension_semantics = [#tpu.dimension_semantics<parallel>, #tpu.dimension_semantics<parallel>], iteration_bounds = array<i64: 1, 2>, scalar_prefetch = 0 : i64, scratch_operands = 0 : i64, tpu.core_type = #tpu.core_type<tc>, window_params = [{transform_indices = @transform_0, window_bounds = array<i64: 16, 256>}, {transform_indices = @transform_1, window_bounds = array<i64: 256, 512>}, {transform_indices = @transform_2, window_bounds = array<i64: 16, 512>}]} {
    %c0 = arith.constant 0 : index
    %c0_0 = arith.constant 0 : index
    %0 = vector.load %arg2[%c0, %c0_0] : memref<16x256xbf16, #tpu.memory_space<vmem>>, vector<16x256xbf16>
    %c0_1 = arith.constant 0 : index
    %c0_2 = arith.constant 0 : index
    %1 = vector.load %arg3[%c0_1, %c0_2] : memref<256x512xbf16, #tpu.memory_space<vmem>>, vector<256x512xbf16>
    %cst = arith.constant dense<0.000000e+00> : vector<16x512xf32>
    %2 = tpu.matmul %0, %1, %cst {dimension_numbers = #tpu.dot_dimension_numbers<[1], [0], [0], [1], [0, 0, 1, 1], [], []>} : vector<16x256xbf16>, vector<256x512xbf16>, vector<16x512xf32> -> vector<16x512xf32>
    %c0_3 = arith.constant 0 : index
    %c0_4 = arith.constant 0 : index
    %3 = vector.load %arg4[%c0_3, %c0_4] : memref<16x512xf32, #tpu.memory_space<vmem>>, vector<16x512xf32>
    tpu.vector_store %arg4[%c0_3, %c0_4], %2 {strides = array<i32>} : memref<16x512xf32, #tpu.memory_space<vmem>>, vector<16x512xf32>,
    return
  }
  func.func @transform_0(%arg0: i32, %arg1: i32) -> (i32, i32) {
    %c0_i32 = arith.constant 0 : i32
    %c0_i32_0 = arith.constant 0 : i32
    return %arg0, %c0_i32 : i32, i32
  }
  func.func @transform_1(%arg0: i32, %arg1: i32) -> (i32, i32) {
    %c0_i32 = arith.constant 0 : i32
    %c0_i32_0 = arith.constant 0 : i32
    return %c0_i32, %arg1 : i32, i32
  }
  func.func @transform_2(%arg0: i32, %arg1: i32) -> (i32, i32) {
    %c0_i32 = arith.constant 0 : i32
    return %arg0, %arg1 : i32, i32
  }
}

</mosaic_0001>

<bundles_post_ra>
// kernel: interpolate_bilinear_align_corners.1
= control target key start
LH: loop header
LB: loop body
LE: loop exit
PB: predicated region body
PF: predicated region fallthrough
CT: control target
= control target key end

     0   :  { %s1412_s9 = smov 0   ;;  %s1414_s10 = smov 0   ;;  %s1792_s0 = inlined_call_operand.vmem [shape: bf16[16,256], index: 0, kind: input, shape index: {}]   ;;  %s1793_s1 = inlined_call_operand.vmem [shape: bf16[256,1024], index: 1, kind: input, shape index: {}]   ;;  %s1794_s2 = inlined_call_operand.vmem [shape: f32[16,1024], index: 2, kind: output, shape index: {}]  }
   0x1   :  { %s1416_s11 = smov 0   ;;  %s1418_s12 = smov 0  }
   0x2   :  { %s1420_s13 = smov 0  }
   0x3 LB: > { %s21_s14 = sadd.s32 1, %s1391_s12  ;;  %s969_s15 = sadd.s32 4294967295, %s1395_s13   ;;  %s1395_s13 = sphi %s1420_s13, %s12_s13   ;;  %s1391_s12 = sphi %s1418_s12, %s1799_s12   ;;  %s1387_s11 = sphi %s1416_s11, %s1798_s11   ;;  %s1383_s10 = sphi %s1414_s10, %s1797_s10   ;;  %s1379_s9 = sphi %s1412_s9, %s1796_s9  }
   0x4   : > { %p22_p0 = scmp.ge.s32.totalorder %s21_s14, 2  ;;  %p64_p1 = scmp.ne.s32.totalorder %s1383_s10, %s1379_s9 }
   0x5   : > { %p65_p2 = scmp.eq.s32.totalorder %s1395_s13, 0  ;;  %p96_p4 = scmp.eq.s32.totalorder %s969_s15, 1 }
   0x6   : > { %s1801_s14 = smov (%p22_p0, %s21_s14), 0  ;;  %s57_s17 = sadd.s32 1, %s1383_s10 }
   0x7   : > { %p66_p3 = por %p65_p2, %p64_p1  ;;  %s54_s16 = ssub.s32 %s1391_s12, %s1801_s14 }
   0x8   : > { %p55_p5 = scmp.eq.s32.totalorder %s54_s16, 0  ;;  %p1447_p6 = por %p96_p4, %p64_p1 }
   0x9   : > { %p973_p7 = scmp.ge.s32.totalorder %s1395_s13, 2 }
   0xa   : > { %s1452_s19 = scalar_select %p55_p5, %s1383_s10, %s57_s17  }
   0xb   : > { %128 = sbr.rel (%p973_p7) target bundleno = 84 (0x54), region = 20 }
  0x10   : > { %131 = sbr.rel (!%p66_p3) target bundleno = 84 (0x54), region = 24  ;;  %s133_s20 = sand.u32 (%p66_p3), 1, %s1383_s10  }
  0x11   : > { %s1249_s21 = sshll.u32 (%p66_p3), %s1391_s12, 4  ;;  %s974_s22 = sshll.u32 (%p66_p3), %s133_s20, 9 }
  0x12   : > { %s1460_s25 = scalar_lea.vmem (%p66_p3), %s1793_s1, %s1249_s21  ;;  %s1465_s26 = scalar_lea.vmem (%p66_p3), [#allocation2], %s974_s22 }
  0x13   : > { %v151_v0 = vld [vmem:[%s1460_s25] sm:$0xff] (%p66_p3)  ;;  %v153_v1 = vld [vmem:[%s1460_s25 + $0x8] sm:$0xff] (%p66_p3) }
  0x14   : > { %v155_v2 = vld [vmem:[%s1460_s25 + $0x20] sm:$0xff] (%p66_p3)  ;;  %152 = vst [vmem:[%s1465_s26] sm:$0xff] (%p66_p3), %v151_v0  ;;  %v157_v3 = vld [vmem:[%s1460_s25 + $0x28] sm:$0xff] (%p66_p3) }
  0x15   : > { %154 = vst [vmem:[%s1465_s26 + $0x8] sm:$0xff] %v153_v1  ;;  %v159_v4 = vld [vmem:[%s1460_s25 + $0x40] sm:$0xff]  ;;  %v161_v5 = vld [vmem:[%s1460_s25 + $0x48] sm:$0xff] }
  0x16   : > { %156 = vst [vmem:[%s1465_s26 + $0x10] sm:$0xff] %v155_v2  ;;  %v163_v6 = vld [vmem:[%s1460_s25 + $0x60] sm:$0xff]  ;;  %v165_v7 = vld [vmem:[%s1460_s25 + $0x68] sm:$0xff] }
  0x17   : > { %158 = vst [vmem:[%s1465_s26 + $0x18] sm:$0xff] %v157_v3  ;;  %v167_v8 = vld [vmem:[%s1460_s25 + $0x80] sm:$0xff]  ;;  %v169_v9 = vld [vmem:[%s1460_s25 + $0x88] sm:$0xff] }
  0x18   : > { %160 = vst [vmem:[%s1465_s26 + $0x20] sm:$0xff] %v159_v4  ;;  %v171_v10 = vld [vmem:[%s1460_s25 + $0xa0] sm:$0xff]  ;;  %v173_v11 = vld [vmem:[%s1460_s25 + $0xa8] sm:$0xff] }
  0x19   : > { %162 = vst [vmem:[%s1465_s26 + $0x28] sm:$0xff] %v161_v5  ;;  %v175_v12 = vld [vmem:[%s1460_s25 + $0xc0] sm:$0xff]  ;;  %v177_v13 = vld [vmem:[%s1460_s25 + $0xc8] sm:$0xff] }
  0x1a   : > { %164 = vst [vmem:[%s1465_s26 + $0x30] sm:$0xff] %v163_v6  ;;  %v179_v14 = vld [vmem:[%s1460_s25 + $0xe0] sm:$0xff]  ;;  %v181_v15 = vld [vmem:[%s1460_s25 + $0xe8] sm:$0xff] }
  0x1b   : > { %166 = vst [vmem:[%s1465_s26 + $0x38] sm:$0xff] %v165_v7  ;;  %v183_v16 = vld [vmem:[%s1460_s25 + $0x100] sm:$0xff]  ;;  %v185_v17 = vld [vmem:[%s1460_s25 + $0x108] sm:$0xff] }
  0x1c   : > { %168 = vst [vmem:[%s1465_s26 + $0x40] sm:$0xff] %v167_v8  ;;  %v187_v18 = vld [vmem:[%s1460_s25 + $0x120] sm:$0xff]  ;;  %v189_v19 = vld [vmem:[%s1460_s25 + $0x128] sm:$0xff] }
  0x1d   : > { %170 = vst [vmem:[%s1465_s26 + $0x48] sm:$0xff] %v169_v9  ;;  %v191_v20 = vld [vmem:[%s1460_s25 + $0x140] sm:$0xff]  ;;  %v193_v21 = vld [vmem:[%s1460_s25 + $0x148] sm:$0xff] }
  0x1e   : > { %172 = vst [vmem:[%s1465_s26 + $0x50] sm:$0xff] %v171_v10  ;;  %v195_v22 = vld [vmem:[%s1460_s25 + $0x160] sm:$0xff]  ;;  %v197_v23 = vld [vmem:[%s1460_s25 + $0x168] sm:$0xff] }
  0x1f   : > { %174 = vst [vmem:[%s1465_s26 + $0x58] sm:$0xff] %v173_v11  ;;  %v199_v24 = vld [vmem:[%s1460_s25 + $0x180] sm:$0xff]  ;;  %v201_v25 = vld [vmem:[%s1460_s25 + $0x188] sm:$0xff] }
  0x20   : > { %176 = vst [vmem:[%s1465_s26 + $0x60] sm:$0xff] %v175_v12  ;;  %v203_v26 = vld [vmem:[%s1460_s25 + $0x1a0] sm:$0xff]  ;;  %v205_v27 = vld [vmem:[%s1460_s25 + $0x1a8] sm:$0xff] }
  0x21   : > { %178 = vst [vmem:[%s1465_s26 + $0x68] sm:$0xff] %v177_v13  ;;  %v207_v28 = vld [vmem:[%s1460_s25 + $0x1c0] sm:$0xff]  ;;  %v209_v29 = vld [vmem:[%s1460_s25 + $0x1c8] sm:$0xff] }
  0x22   : > { %180 = vst [vmem:[%s1465_s26 + $0x70] sm:$0xff] %v179_v14  ;;  %v211_v30 = vld [vmem:[%s1460_s25 + $0x1e0] sm:$0xff]  ;;  %v213_v31 = vld [vmem:[%s1460_s25 + $0x1e8] sm:$0xff] }
  0x23   : > { %182 = vst [vmem:[%s1465_s26 + $0x78] sm:$0xff] %v181_v15  ;;  %v215_v32 = vld [vmem:[%s1460_s25 + $0x200] sm:$0xff]  ;;  %v217_v33 = vld [vmem:[%s1460_s25 + $0x208] sm:$0xff] }
  0x24   : > { %184 = vst [vmem:[%s1465_s26 + $0x80] sm:$0xff] %v183_v16  ;;  %v219_v34 = vld [vmem:[%s1460_s25 + $0x220] sm:$0xff]  ;;  %v221_v35 = vld [vmem:[%s1460_s25 + $0x228] sm:$0xff] }
  0x25   : > { %186 = vst [vmem:[%s1465_s26 + $0x88] sm:$0xff] %v185_v17  ;;  %v223_v36 = vld [vmem:[%s1460_s25 + $0x240] sm:$0xff]  ;;  %v225_v37 = vld [vmem:[%s1460_s25 + $0x248] sm:$0xff] }
  0x26   : > { %188 = vst [vmem:[%s1465_s26 + $0x90] sm:$0xff] %v187_v18  ;;  %v227_v38 = vld [vmem:[%s1460_s25 + $0x260] sm:$0xff]  ;;  %v229_v39 = vld [vmem:[%s1460_s25 + $0x268] sm:$0xff] }
  0x27   : > { %190 = vst [vmem:[%s1465_s26 + $0x98] sm:$0xff] %v189_v19  ;;  %v231_v40 = vld [vmem:[%s1460_s25 + $0x280] sm:$0xff]  ;;  %v233_v41 = vld [vmem:[%s1460_s25 + $0x288] sm:$0xff] }
  0x28   : > { %192 = vst [vmem:[%s1465_s26 + $0xa0] sm:$0xff] %v191_v20  ;;  %v235_v42 = vld [vmem:[%s1460_s25 + $0x2a0] sm:$0xff]  ;;  %v237_v43 = vld [vmem:[%s1460_s25 + $0x2a8] sm:$0xff] }
  0x29   : > { %194 = vst [vmem:[%s1465_s26 + $0xa8] sm:$0xff] %v193_v21  ;;  %v239_v44 = vld [vmem:[%s1460_s25 + $0x2c0] sm:$0xff]  ;;  %v241_v45 = vld [vmem:[%s1460_s25 + $0x2c8] sm:$0xff] }
  0x2a   : > { %196 = vst [vmem:[%s1465_s26 + $0xb0] sm:$0xff] %v195_v22  ;;  %v243_v46 = vld [vmem:[%s1460_s25 + $0x2e0] sm:$0xff]  ;;  %v245_v47 = vld [vmem:[%s1460_s25 + $0x2e8] sm:$0xff] }
  0x2b   : > { %198 = vst [vmem:[%s1465_s26 + $0xb8] sm:$0xff] %v197_v23  ;;  %v247_v48 = vld [vmem:[%s1460_s25 + $0x300] sm:$0xff]  ;;  %v249_v49 = vld [vmem:[%s1460_s25 + $0x308] sm:$0xff] }
  0x2c   : > { %200 = vst [vmem:[%s1465_s26 + $0xc0] sm:$0xff] %v199_v24  ;;  %v251_v50 = vld [vmem:[%s1460_s25 + $0x320] sm:$0xff]  ;;  %v253_v51 = vld [vmem:[%s1460_s25 + $0x328] sm:$0xff] }
  0x2d   : > { %202 = vst [vmem:[%s1465_s26 + $0xc8] sm:$0xff] %v201_v25  ;;  %v255_v52 = vld [vmem:[%s1460_s25 + $0x340] sm:$0xff]  ;;  %v257_v53 = vld [vmem:[%s1460_s25 + $0x348] sm:$0xff] }
  0x2e   : > { %204 = vst [vmem:[%s1465_s26 + $0xd0] sm:$0xff] %v203_v26  ;;  %v259_v54 = vld [vmem:[%s1460_s25 + $0x360] sm:$0xff]  ;;  %v261_v55 = vld [vmem:[%s1460_s25 + $0x368] sm:$0xff] }
  0x2f   : > { %206 = vst [vmem:[%s1465_s26 + $0xd8] sm:$0xff] %v205_v27  ;;  %v263_v56 = vld [vmem:[%s1460_s25 + $0x380] sm:$0xff]  ;;  %v265_v57 = vld [vmem:[%s1460_s25 + $0x388] sm:$0xff] }
  0x30   : > { %208 = vst [vmem:[%s1465_s26 + $0xe0] sm:$0xff] %v207_v28  ;;  %v267_v58 = vld [vmem:[%s1460_s25 + $0x3a0] sm:$0xff]  ;;  %v269_v59 = vld [vmem:[%s1460_s25 + $0x3a8] sm:$0xff] }
  0x31   : > { %210 = vst [vmem:[%s1465_s26 + $0xe8] sm:$0xff] %v209_v29  ;;  %v271_v60 = vld [vmem:[%s1460_s25 + $0x3c0] sm:$0xff]  ;;  %v273_v61 = vld [vmem:[%s1460_s25 + $0x3c8] sm:$0xff] }
  0x32   : > { %212 = vst [vmem:[%s1465_s26 + $0xf0] sm:$0xff] %v211_v30  ;;  %v275_v62 = vld [vmem:[%s1460_s25 + $0x3e0] sm:$0xff]  ;;  %v277_v63 = vld [vmem:[%s1460_s25 + $0x3e8] sm:$0xff] }
  0x33   : > { %214 = vst [vmem:[%s1465_s26 + $0xf8] sm:$0xff] %v213_v31 }
  0x34   : > { %216 = vst [vmem:[%s1465_s26 + $0x100] sm:$0xff] %v215_v32 }
  0x35   : > { %218 = vst [vmem:[%s1465_s26 + $0x108] sm:$0xff] %v217_v33 }
  0x36   : > { %220 = vst [vmem:[%s1465_s26 + $0x110] sm:$0xff] %v219_v34 }
  0x37   : > { %222 = vst [vmem:[%s1465_s26 + $0x118] sm:$0xff] %v221_v35 }
  0x38   : > { %224 = vst [vmem:[%s1465_s26 + $0x120] sm:$0xff] %v223_v36 }
  0x39   : > { %226 = vst [vmem:[%s1465_s26 + $0x128] sm:$0xff] %v225_v37 }
  0x3a   : > { %228 = vst [vmem:[%s1465_s26 + $0x130] sm:$0xff] %v227_v38 }
  0x3b   : > { %230 = vst [vmem:[%s1465_s26 + $0x138] sm:$0xff] %v229_v39 }
  0x3c   : > { %232 = vst [vmem:[%s1465_s26 + $0x140] sm:$0xff] %v231_v40 }
  0x3d   : > { %234 = vst [vmem:[%s1465_s26 + $0x148] sm:$0xff] %v233_v41 }
  0x3e   : > { %236 = vst [vmem:[%s1465_s26 + $0x150] sm:$0xff] %v235_v42 }
  0x3f   : > { %238 = vst [vmem:[%s1465_s26 + $0x158] sm:$0xff] %v237_v43 }
  0x40   : > { %240 = vst [vmem:[%s1465_s26 + $0x160] sm:$0xff] %v239_v44 }
  0x41   : > { %242 = vst [vmem:[%s1465_s26 + $0x168] sm:$0xff] %v241_v45 }
  0x42   : > { %244 = vst [vmem:[%s1465_s26 + $0x170] sm:$0xff] %v243_v46 }
  0x43   : > { %246 = vst [vmem:[%s1465_s26 + $0x178] sm:$0xff] %v245_v47 }
  0x44   : > { %248 = vst [vmem:[%s1465_s26 + $0x180] sm:$0xff] %v247_v48 }
  0x45   : > { %250 = vst [vmem:[%s1465_s26 + $0x188] sm:$0xff] %v249_v49 }
  0x46   : > { %252 = vst [vmem:[%s1465_s26 + $0x190] sm:$0xff] %v251_v50 }
  0x47   : > { %254 = vst [vmem:[%s1465_s26 + $0x198] sm:$0xff] %v253_v51 }
  0x48   : > { %256 = vst [vmem:[%s1465_s26 + $0x1a0] sm:$0xff] %v255_v52 }
  0x49   : > { %258 = vst [vmem:[%s1465_s26 + $0x1a8] sm:$0xff] %v257_v53 }
  0x4a   : > { %260 = vst [vmem:[%s1465_s26 + $0x1b0] sm:$0xff] %v259_v54 }
  0x4b   : > { %262 = vst [vmem:[%s1465_s26 + $0x1b8] sm:$0xff] %v261_v55 }
  0x4c   : > { %264 = vst [vmem:[%s1465_s26 + $0x1c0] sm:$0xff] %v263_v56 }
  0x4d   : > { %266 = vst [vmem:[%s1465_s26 + $0x1c8] sm:$0xff] %v265_v57 }
  0x4e   : > { %268 = vst [vmem:[%s1465_s26 + $0x1d0] sm:$0xff] %v267_v58 }
  0x4f   : > { %270 = vst [vmem:[%s1465_s26 + $0x1d8] sm:$0xff] %v269_v59 }
  0x50   : > { %272 = vst [vmem:[%s1465_s26 + $0x1e0] sm:$0xff] %v271_v60 }
  0x51   : > { %274 = vst [vmem:[%s1465_s26 + $0x1e8] sm:$0xff] %v273_v61 }
  0x52   : > { %276 = vst [vmem:[%s1465_s26 + $0x1f0] sm:$0xff] %v275_v62 }
  0x53   : > { %278 = vst [vmem:[%s1465_s26 + $0x1f8] sm:$0xff] %v277_v63 }
  0x54 PF: > { %p977_p8 = scmp.ge.s32.totalorder %s1395_s13, 1  ;;  %p283_p9 = scmp.lt.s32.totalorder %s1395_s13, 3 }
  0x56   : > { %p284_p10 = pnand %p977_p8, %p283_p9 }
  0x57   : > { %s290_s27 = sand.u32 (!%p284_p10), 1, %s1379_s9  }
  0x58   : > { %287 = sbr.rel (%p284_p10) target bundleno = 312 (0x138), region = 47  ;;  %s978_s28 = sshll.u32 (!%p284_p10), %s290_s27, 9 }
  0x59   : > { %s1597_s29 = scalar_lea.vmem (!%p284_p10), [#allocation2], %s978_s28  ;;  %s979_s16 = sshll.u32 (!%p284_p10), %s290_s27, 6 }
  0x5a   : > { %s1753_s17 = scalar_lea.vmem (!%p284_p10), [#allocation3], %s979_s16 }
  0x5d   : > { %v1102_v0 = vld [vmem:[%s1597_s29 + $0xe0] sm:$0xf]  ;;  %v1282_v1 = vld [vmem:[%s1597_s29 + $0xec] sm:$0xf0]  ;;  %v1280_v5 = vld [vmem:[%s1597_s29 + $0xe4] sm:$0xf] }
  0x5e   : > { %v1230_v2 = vld [vmem:[%s1597_s29 + $0x1e0] sm:$0xf]  ;;  %v1103_v3 = vor.u32 %v1282_v1, %v1102_v0  ;;  %v1314_v4 = vld [vmem:[%s1597_s29 + $0x1ec] sm:$0xf0]  ;;  %v1104_v6 = vld [vmem:[%s1597_s29 + $0xf0] sm:$0xf0] }
  0x5f   : > { %v1231_v7 = vor.u32 %v1314_v4, %v1230_v2  ;;  %v1107_v8 = vor.u32 %v1280_v5, %v1104_v6  ;;  %v1312_v9 = vld [vmem:[%s1597_s29 + $0x1e4] sm:$0xf]  ;;  %v1232_v10 = vld [vmem:[%s1597_s29 + $0x1f0] sm:$0xf0]  ;;  %v1086_v11 = vld [vmem:[%s1597_s29 + $0xc0] sm:$0xf] }
  0x60   : > { %722 = vmatpush.bf16.msra.mxu0 %v1103_v3  ;;  %v1235_v12 = vor.u32 %v1312_v9, %v1232_v10  ;;  %v1278_v13 = vld [vmem:[%s1597_s29 + $0xcc] sm:$0xf0]  ;;  %v1214_v14 = vld [vmem:[%s1597_s29 + $0x1c0] sm:$0xf]  ;;  %v1276_v18 = vld [vmem:[%s1597_s29 + $0xc4] sm:$0xf] }
  0x61   : > { %v1310_v15 = vld [vmem:[%s1597_s29 + $0x1cc] sm:$0xf0]  ;;  %736 = vmatpush.bf16.msra.mxu1 %v1231_v7  ;;  %750 = vmatpush.bf16.msra.mxu2 %v1107_v8  ;;  %v1087_v16 = vor.u32 %v1278_v13, %v1086_v11  ;;  %v1088_v19 = vld [vmem:[%s1597_s29 + $0xd0] sm:$0xf0]  ;;  %v1308_v20 = vld [vmem:[%s1597_s29 + $0x1c4] sm:$0xf] }
  0x62   : > { %v1215_v17 = vor.u32 %v1310_v15, %v1214_v14  ;;  %764 = vmatpush.bf16.msra.mxu3 %v1235_v12  ;;  %v1091_v21 = vor.u32 %v1276_v18, %v1088_v19  ;;  %v1216_v22 = vld [vmem:[%s1597_s29 + $0x1d0] sm:$0xf0]  ;;  %v1070_v23 = vld [vmem:[%s1597_s29 + $0xa0] sm:$0xf]  ;;  %v1274_v24 = vld [vmem:[%s1597_s29 + $0xac] sm:$0xf0] }
  0x63   : > { %v1219_v25 = vor.u32 %v1308_v20, %v1216_v22  ;;  %v1198_v26 = vld [vmem:[%s1597_s29 + $0x1a0] sm:$0xf]  ;;  %v1306_v27 = vld [vmem:[%s1597_s29 + $0x1ac] sm:$0xf0]  ;;  %v1272_v28 = vld [vmem:[%s1597_s29 + $0xa4] sm:$0xf]  ;;  %v1071_v29 = vor.u32 %v1274_v24, %v1070_v23 }
  0x64   : > { %723 = vmatpush.bf16.msra.mxu0 %v1087_v16  ;;  %v1072_v30 = vld [vmem:[%s1597_s29 + $0xb0] sm:$0xf0]  ;;  %v1304_v31 = vld [vmem:[%s1597_s29 + $0x1a4] sm:$0xf]  ;;  %v1199_v33 = vor.u32 %v1306_v27, %v1198_v26  ;;  %v1054_v35 = vld [vmem:[%s1597_s29 + $0x80] sm:$0xf] }
  0x65   : > { %v1200_v32 = vld [vmem:[%s1597_s29 + $0x1b0] sm:$0xf0]  ;;  %737 = vmatpush.bf16.msra.mxu1 %v1215_v17  ;;  %751 = vmatpush.bf16.msra.mxu2 %v1091_v21  ;;  %v1075_v34 = vor.u32 %v1272_v28, %v1072_v30  ;;  %v1270_v36 = vld [vmem:[%s1597_s29 + $0x8c] sm:$0xf0]  ;;  %v1182_v37 = vld [vmem:[%s1597_s29 + $0x180] sm:$0xf] }
  0x66   : > { %765 = vmatpush.bf16.msra.mxu3 %v1219_v25  ;;  %v1203_v38 = vor.u32 %v1304_v31, %v1200_v32  ;;  %v1302_v39 = vld [vmem:[%s1597_s29 + $0x18c] sm:$0xf0]  ;;  %v1268_v40 = vld [vmem:[%s1597_s29 + $0x84] sm:$0xf]  ;;  %v1056_v41 = vld [vmem:[%s1597_s29 + $0x90] sm:$0xf0]  ;;  %v1055_v44 = vor.u32 %v1270_v36, %v1054_v35 }
  0x67   : > { %v1300_v42 = vld [vmem:[%s1597_s29 + $0x184] sm:$0xf]  ;;  %v1184_v43 = vld [vmem:[%s1597_s29 + $0x190] sm:$0xf0]  ;;  %v1183_v45 = vor.u32 %v1302_v39, %v1182_v37  ;;  %v1059_v46 = vor.u32 %v1268_v40, %v1056_v41  ;;  %v1038_v47 = vld [vmem:[%s1597_s29 + $0x60] sm:$0xf] }
  0x68   : > { %724 = vmatpush.bf16.msra.mxu0 %v1071_v29  ;;  %v1266_v48 = vld [vmem:[%s1597_s29 + $0x6c] sm:$0xf0]  ;;  %v1166_v49 = vld [vmem:[%s1597_s29 + $0x160] sm:$0xf]  ;;  %v1187_v50 = vor.u32 %v1300_v42, %v1184_v43  ;;  %v1264_v52 = vld [vmem:[%s1597_s29 + $0x64] sm:$0xf] }
  0x69   : > { %738 = vmatpush.bf16.msra.mxu1 %v1199_v33  ;;  %752 = vmatpush.bf16.msra.mxu2 %v1075_v34  ;;  %v1298_v51 = vld [vmem:[%s1597_s29 + $0x16c] sm:$0xf0]  ;;  %v1040_v53 = vld [vmem:[%s1597_s29 + $0x70] sm:$0xf0]  ;;  %v1296_v54 = vld [vmem:[%s1597_s29 + $0x164] sm:$0xf]  ;;  %v1039_v56 = vor.u32 %v1266_v48, %v1038_v47 }
  0x6a   : > { %766 = vmatpush.bf16.msra.mxu3 %v1203_v38  ;;  %v1168_v55 = vld [vmem:[%s1597_s29 + $0x170] sm:$0xf0]  ;;  %v1167_v57 = vor.u32 %v1298_v51, %v1166_v49  ;;  %v1043_v58 = vor.u32 %v1264_v52, %v1040_v53  ;;  %v1022_v59 = vld [vmem:[%s1597_s29 + $0x40] sm:$0xf]  ;;  %v1262_v60 = vld [vmem:[%s1597_s29 + $0x4c] sm:$0xf0] }
  0x6b   : > { %v1150_v61 = vld [vmem:[%s1597_s29 + $0x140] sm:$0xf]  ;;  %v1171_v62 = vor.u32 %v1296_v54, %v1168_v55  ;;  %v1294_v63 = vld [vmem:[%s1597_s29 + $0x14c] sm:$0xf0]  ;;  %v1260_v0 = vld [vmem:[%s1597_s29 + $0x44] sm:$0xf]  ;;  %v1023_v4 = vor.u32 %v1262_v60, %v1022_v59 }
  0x6c   : > { %725 = vmatpush.bf16.msra.mxu0 %v1055_v44  ;;  %v1024_v1 = vld [vmem:[%s1597_s29 + $0x50] sm:$0xf0]  ;;  %v1292_v2 = vld [vmem:[%s1597_s29 + $0x144] sm:$0xf]  ;;  %v1151_v5 = vor.u32 %v1294_v63, %v1150_v61  ;;  %v1006_v7 = vld [vmem:[%s1597_s29 + $0x20] sm:$0xf] }
  0x6d   : > { %739 = vmatpush.bf16.msra.mxu1 %v1183_v45  ;;  %753 = vmatpush.bf16.msra.mxu2 %v1059_v46  ;;  %v1152_v3 = vld [vmem:[%s1597_s29 + $0x150] sm:$0xf0]  ;;  %v1027_v6 = vor.u32 %v1260_v0, %v1024_v1  ;;  %v1258_v8 = vld [vmem:[%s1597_s29 + $0x2c] sm:$0xf0]  ;;  %v1134_v9 = vld [vmem:[%s1597_s29 + $0x120] sm:$0xf] }
  0x6e   : > { %767 = vmatpush.bf16.msra.mxu3 %v1187_v50  ;;  %v1155_v10 = vor.u32 %v1292_v2, %v1152_v3  ;;  %v1290_v11 = vld [vmem:[%s1597_s29 + $0x12c] sm:$0xf0]  ;;  %v1256_v12 = vld [vmem:[%s1597_s29 + $0x24] sm:$0xf]  ;;  %v1008_v13 = vld [vmem:[%s1597_s29 + $0x30] sm:$0xf0]  ;;  %v1007_v16 = vor.u32 %v1258_v8, %v1006_v7 }
  0x6f   : > { %v1288_v14 = vld [vmem:[%s1597_s29 + $0x124] sm:$0xf]  ;;  %v1136_v15 = vld [vmem:[%s1597_s29 + $0x130] sm:$0xf0]  ;;  %v990_v17 = vld [vmem:[%s1597_s29] sm:$0xf]  ;;  %v1135_v20 = vor.u32 %v1290_v11, %v1134_v9  ;;  %v1011_v21 = vor.u32 %v1256_v12, %v1008_v13 }
  0x70   : > { %726 = vmatpush.bf16.msra.mxu0 %v1039_v56  ;;  %v1254_v18 = vld [vmem:[%s1597_s29 + $0xc] sm:$0xf0]  ;;  %v1118_v19 = vld [vmem:[%s1597_s29 + $0x100] sm:$0xf]  ;;  %v1252_v23 = vld [vmem:[%s1597_s29 + $0x4] sm:$0xf]  ;;  %v1139_v25 = vor.u32 %v1288_v14, %v1136_v15 }
  0x71   : > { %740 = vmatpush.bf16.msra.mxu1 %v1167_v57  ;;  %754 = vmatpush.bf16.msra.mxu2 %v1043_v58  ;;  %v1286_v22 = vld [vmem:[%s1597_s29 + $0x10c] sm:$0xf0]  ;;  %v992_v24 = vld [vmem:[%s1597_s29 + $0x10] sm:$0xf0]  ;;  %v1284_v26 = vld [vmem:[%s1597_s29 + $0x104] sm:$0xf]  ;;  %v991_v32 = vor.u32 %v1254_v18, %v990_v17 }
  0x72   : > { %768 = vmatpush.bf16.msra.mxu3 %v1171_v62  ;;  %v1120_v27 = vld [vmem:[%s1597_s29 + $0x110] sm:$0xf0]  ;;  %v1110_v28 = vld [vmem:[%s1597_s29 + $0xe8] sm:$0xf]  ;;  %v1283_v29 = vld [vmem:[%s1597_s29 + $0xf4] sm:$0xf0]  ;;  %v1119_v36 = vor.u32 %v1286_v22, %v1118_v19  ;;  %v995_v37 = vor.u32 %v1252_v23, %v992_v24 }
  0x73   : > { %v1238_v30 = vld [vmem:[%s1597_s29 + $0x1e8] sm:$0xf]  ;;  %v1315_v31 = vld [vmem:[%s1597_s29 + $0x1f4] sm:$0xf0]  ;;  %v1281_v33 = vld [vmem:[%s1597_s29 + $0xec] sm:$0xf]  ;;  %v1123_v41 = vor.u32 %v1284_v26, %v1120_v27  ;;  %v1111_v42 = vor.u32 %v1283_v29, %v1110_v28 }
  0x74   : > { %727 = vmatpush.bf16.msra.mxu0 %v1023_v4  ;;  %v1112_v34 = vld [vmem:[%s1597_s29 + $0xf8] sm:$0xf0]  ;;  %v1313_v35 = vld [vmem:[%s1597_s29 + $0x1ec] sm:$0xf]  ;;  %v982_v39 = vld [vmem:[%s1792_s0] sm:$0xf]  ;;  %v1239_v45 = vor.u32 %v1315_v31, %v1238_v30 }
  0x75   : > { %741 = vmatpush.bf16.msra.mxu1 %v1151_v5  ;;  %755 = vmatpush.bf16.msra.mxu2 %v1027_v6  ;;  %v1240_v38 = vld [vmem:[%s1597_s29 + $0x1f8] sm:$0xf0]  ;;  %v1251_v40 = vld [vmem:[%s1792_s0 + $0x4] sm:$0xf0]  ;;  %v1250_v43 = vld [vmem:[%s1792_s0 + $0x4] sm:$0xf]  ;;  %v1115_v46 = vor.u32 %v1281_v33, %v1112_v34 }
  0x76   : > { %769 = vmatpush.bf16.msra.mxu3 %v1155_v10  ;;  %v984_v44 = vld [vmem:[%s1792_s0 + $0x8] sm:$0xf0]  ;;  %v1094_v47 = vld [vmem:[%s1597_s29 + $0xc8] sm:$0xf]  ;;  %v1279_v48 = vld [vmem:[%s1597_s29 + $0xd4] sm:$0xf0]  ;;  %v1243_v50 = vor.u32 %v1313_v35, %v1240_v38  ;;  %v1689_v54 = vor.u32 %v1251_v40, %v982_v39 }
  0x77   : > { %v1222_v49 = vld [vmem:[%s1597_s29 + $0x1c8] sm:$0xf]  ;;  %v1311_v51 = vld [vmem:[%s1597_s29 + $0x1d4] sm:$0xf0]  ;;  %v1277_v52 = vld [vmem:[%s1597_s29 + $0xcc] sm:$0xf]  ;;  %v1693_v57 = vor.u32 %v1250_v43, %v984_v44  ;;  %v1095_v58 = vor.u32 %v1279_v48, %v1094_v47 }
  0x78   : > { %728 = vmatpush.bf16.msra.mxu0 %v1007_v16  ;;  %v1096_v53 = vld [vmem:[%s1597_s29 + $0xd8] sm:$0xf0]  ;;  %v1309_v55 = vld [vmem:[%s1597_s29 + $0x1cc] sm:$0xf]  ;;  %v1223_v59 = vor.u32 %v1311_v51, %v1222_v49  ;;  %v1078_v61 = vld [vmem:[%s1597_s29 + $0xa8] sm:$0xf] }
  0x79   : > { %742 = vmatpush.bf16.msra.mxu1 %v1135_v20  ;;  %756 = vmatpush.bf16.msra.mxu2 %v1011_v21  ;;  %v1224_v56 = vld [vmem:[%s1597_s29 + $0x1d8] sm:$0xf0]  ;;  %v1099_v60 = vor.u32 %v1277_v52, %v1096_v53  ;;  %v1275_v62 = vld [vmem:[%s1597_s29 + $0xb4] sm:$0xf0]  ;;  %v1206_v63 = vld [vmem:[%s1597_s29 + $0x1a8] sm:$0xf] }
  0x7a   : > { %770 = vmatpush.bf16.msra.mxu3 %v1139_v25  ;;  %v1227_v0 = vor.u32 %v1309_v55, %v1224_v56  ;;  %v1307_v1 = vld [vmem:[%s1597_s29 + $0x1b4] sm:$0xf0]  ;;  %v1273_v2 = vld [vmem:[%s1597_s29 + $0xac] sm:$0xf]  ;;  %v1080_v3 = vld [vmem:[%s1597_s29 + $0xb8] sm:$0xf0]  ;;  %v1079_v6 = vor.u32 %v1275_v62, %v1078_v61 }
  0x7b   : > { %v1305_v4 = vld [vmem:[%s1597_s29 + $0x1ac] sm:$0xf]  ;;  %v1208_v5 = vld [vmem:[%s1597_s29 + $0x1b8] sm:$0xf0]  ;;  %v1207_v7 = vor.u32 %v1307_v1, %v1206_v63  ;;  %v1083_v8 = vor.u32 %v1273_v2, %v1080_v3  ;;  %v1062_v9 = vld [vmem:[%s1597_s29 + $0x88] sm:$0xf] }
  0x7c   : > { %729 = vmatpush.bf16.msra.mxu0 %v991_v32  ;;  %v1271_v10 = vld [vmem:[%s1597_s29 + $0x94] sm:$0xf0]  ;;  %v1190_v11 = vld [vmem:[%s1597_s29 + $0x188] sm:$0xf]  ;;  %v1211_v12 = vor.u32 %v1305_v4, %v1208_v5  ;;  %v1269_v14 = vld [vmem:[%s1597_s29 + $0x8c] sm:$0xf] }
  0x7d   : > { %743 = vmatpush.bf16.msra.mxu1 %v1119_v36  ;;  %757 = vmatpush.bf16.msra.mxu2 %v995_v37  ;;  %v1303_v13 = vld [vmem:[%s1597_s29 + $0x194] sm:$0xf0]  ;;  %v1064_v15 = vld [vmem:[%s1597_s29 + $0x98] sm:$0xf0]  ;;  %v1301_v16 = vld [vmem:[%s1597_s29 + $0x18c] sm:$0xf]  ;;  %v1063_v18 = vor.u32 %v1271_v10, %v1062_v9 }
  0x7e   : > { %771 = vmatpush.bf16.msra.mxu3 %v1123_v41  ;;  %v1192_v17 = vld [vmem:[%s1597_s29 + $0x198] sm:$0xf0]  ;;  %v1191_v19 = vor.u32 %v1303_v13, %v1190_v11  ;;  %v1067_v20 = vor.u32 %v1269_v14, %v1064_v15  ;;  %v1046_v21 = vld [vmem:[%s1597_s29 + $0x68] sm:$0xf]  ;;  %v1267_v22 = vld [vmem:[%s1597_s29 + $0x74] sm:$0xf0] }
  0x7f   : > { %730 = vmatmul.bf16.vlgmr.msra.gmra.mxu0 %v1689_v54  ;;  %v1174_v23 = vld [vmem:[%s1597_s29 + $0x168] sm:$0xf]  ;;  %v1195_v24 = vor.u32 %v1301_v16, %v1192_v17  ;;  %v1299_v25 = vld [vmem:[%s1597_s29 + $0x174] sm:$0xf0]  ;;  %v1265_v26 = vld [vmem:[%s1597_s29 + $0x6c] sm:$0xf]  ;;  %v1047_v30 = vor.u32 %v1267_v22, %v1046_v21 }
  0x80   : > { %778 = vmatpush.bf16.msrb.mxu0 %v1111_v42  ;;  %758 = vmatmul.bf16.vlgmr.msra.gmra.mxu2 %v1689_v54  ;;  %v1048_v27 = vld [vmem:[%s1597_s29 + $0x78] sm:$0xf0]  ;;  %v1297_v28 = vld [vmem:[%s1597_s29 + $0x16c] sm:$0xf]  ;;  %v1175_v31 = vor.u32 %v1299_v25, %v1174_v23  ;;  %v1030_v33 = vld [vmem:[%s1597_s29 + $0x48] sm:$0xf] }
  0x81   : > { %792 = vmatpush.bf16.msrb.mxu1 %v1239_v45  ;;  %806 = vmatpush.bf16.msrb.mxu2 %v1115_v46  ;;  %v1176_v29 = vld [vmem:[%s1597_s29 + $0x178] sm:$0xf0]  ;;  %v1051_v32 = vor.u32 %v1265_v26, %v1048_v27  ;;  %v1263_v34 = vld [vmem:[%s1597_s29 + $0x54] sm:$0xf0]  ;;  %v1158_v35 = vld [vmem:[%s1597_s29 + $0x148] sm:$0xf] }
  0x82   : > { %820 = vmatpush.bf16.msrb.mxu3 %v1243_v50  ;;  %744 = vmatmul.bf16.vlgmr.msra.gmra.mxu1 %v1693_v57  ;;  %v1179_v36 = vor.u32 %v1297_v28, %v1176_v29  ;;  %v1295_v37 = vld [vmem:[%s1597_s29 + $0x154] sm:$0xf0]  ;;  %v1261_v38 = vld [vmem:[%s1597_s29 + $0x4c] sm:$0xf]  ;;  %v1032_v39 = vld [vmem:[%s1597_s29 + $0x58] sm:$0xf0]  ;;  %v1031_v42 = vor.u32 %v1263_v34, %v1030_v33 }
  0x83   : > { %772 = vmatmul.bf16.vlgmr.msra.gmra.mxu3 %v1693_v57  ;;  %v1293_v40 = vld [vmem:[%s1597_s29 + $0x14c] sm:$0xf]  ;;  %v1160_v41 = vld [vmem:[%s1597_s29 + $0x158] sm:$0xf0]  ;;  %v1159_v43 = vor.u32 %v1295_v37, %v1158_v35  ;;  %v1035_v44 = vor.u32 %v1261_v38, %v1032_v39  ;;  %v1014_v45 = vld [vmem:[%s1597_s29 + $0x28] sm:$0xf] }
  0x84   : > { %779 = vmatpush.bf16.msrb.mxu0 %v1095_v58  ;;  %v1259_v46 = vld [vmem:[%s1597_s29 + $0x34] sm:$0xf0]  ;;  %v1142_v47 = vld [vmem:[%s1597_s29 + $0x128] sm:$0xf]  ;;  %v1163_v48 = vor.u32 %v1293_v40, %v1160_v41  ;;  %v1257_v50 = vld [vmem:[%s1597_s29 + $0x2c] sm:$0xf] }
  0x85   : > { %793 = vmatpush.bf16.msrb.mxu1 %v1223_v59  ;;  %807 = vmatpush.bf16.msrb.mxu2 %v1099_v60  ;;  %v1291_v49 = vld [vmem:[%s1597_s29 + $0x134] sm:$0xf0]  ;;  %v1016_v51 = vld [vmem:[%s1597_s29 + $0x38] sm:$0xf0]  ;;  %v1289_v52 = vld [vmem:[%s1597_s29 + $0x12c] sm:$0xf]  ;;  %v1015_v55 = vor.u32 %v1259_v46, %v1014_v45 }
  0x86   : > { %821 = vmatpush.bf16.msrb.mxu3 %v1227_v0  ;;  %v1144_v53 = vld [vmem:[%s1597_s29 + $0x138] sm:$0xf0]  ;;  %v1143_v56 = vor.u32 %v1291_v49, %v1142_v47  ;;  %v1019_v58 = vor.u32 %v1257_v50, %v1016_v51  ;;  %v998_v59 = vld [vmem:[%s1597_s29 + $0x8] sm:$0xf]  ;;  %v1255_v60 = vld [vmem:[%s1597_s29 + $0x14] sm:$0xf0] }
  0x87   : > { %v1126_v61 = vld [vmem:[%s1597_s29 + $0x108] sm:$0xf]  ;;  %v1147_v62 = vor.u32 %v1289_v52, %v1144_v53  ;;  %v1287_v63 = vld [vmem:[%s1597_s29 + $0x114] sm:$0xf0]  ;;  %v1253_v0 = vld [vmem:[%s1597_s29 + $0xc] sm:$0xf]  ;;  %v999_v4 = vor.u32 %v1255_v60, %v998_v59 }
  0x88   : > { %780 = vmatpush.bf16.msrb.mxu0 %v1079_v6  ;;  %v1000_v1 = vld [vmem:[%s1597_s29 + $0x18] sm:$0xf0]  ;;  %v1285_v2 = vld [vmem:[%s1597_s29 + $0x10c] sm:$0xf]  ;;  %v1127_v5 = vor.u32 %v1287_v63, %v1126_v61  ;;  %s1316_s9 = sshll.u32 (%p1447_p6), %s1387_s11, 5 }
  0x89   : > { %794 = vmatpush.bf16.msrb.mxu1 %v1207_v7  ;;  %808 = vmatpush.bf16.msrb.mxu2 %v1083_v8  ;;  %v1128_v3 = vld [vmem:[%s1597_s29 + $0x118] sm:$0xf0]  ;;  %v1003_v6 = vor.u32 %v1253_v0, %v1000_v1  ;;  %s854_s22 = scalar_lea.vmem (%p1447_p6), %s1794_s2, %s1316_s9 }
  0x8a   : > { %822 = vmatpush.bf16.msrb.mxu3 %v1211_v12  ;;  %v1131_v7 = vor.u32 %v1285_v2, %v1128_v3 }
  0x8c   : > { %781 = vmatpush.bf16.msrb.mxu0 %v1063_v18 }
  0x8d   : > { %795 = vmatpush.bf16.msrb.mxu1 %v1191_v19  ;;  %809 = vmatpush.bf16.msrb.mxu2 %v1067_v20 }
  0x8e   : > { %823 = vmatpush.bf16.msrb.mxu3 %v1195_v24 }
  0x90   : > { %782 = vmatpush.bf16.msrb.mxu0 %v1047_v30 }
  0x91   : > { %796 = vmatpush.bf16.msrb.mxu1 %v1175_v31  ;;  %810 = vmatpush.bf16.msrb.mxu2 %v1051_v32 }
  0x92   : > { %824 = vmatpush.bf16.msrb.mxu3 %v1179_v36 }
  0x94   : > { %783 = vmatpush.bf16.msrb.mxu0 %v1031_v42 }
  0x95   : > { %797 = vmatpush.bf16.msrb.mxu1 %v1159_v43  ;;  %811 = vmatpush.bf16.msrb.mxu2 %v1035_v44 }
  0x96   : > { %825 = vmatpush.bf16.msrb.mxu3 %v1163_v48 }
  0x98   : > { %784 = vmatpush.bf16.msrb.mxu0 %v1015_v55 }
  0x99   : > { %798 = vmatpush.bf16.msrb.mxu1 %v1143_v56  ;;  %812 = vmatpush.bf16.msrb.mxu2 %v1019_v58 }
  0x9a   : > { %826 = vmatpush.bf16.msrb.mxu3 %v1147_v62 }
  0x9c   : > { %785 = vmatpush.bf16.msrb.mxu0 %v999_v4 }
  0x9d   : > { %799 = vmatpush.bf16.msrb.mxu1 %v1127_v5  ;;  %813 = vmatpush.bf16.msrb.mxu2 %v1003_v6 }
  0x9e   : > { %827 = vmatpush.bf16.msrb.mxu3 %v1131_v7 }
  0x9f   : > { %786 = vmatmul.bf16.vlgmr.msrb.gmra.mxu0 %v1689_v54 }
  0xa0   : > { %800 = vmatmul.bf16.vlgmr.msrb.gmra.mxu1 %v1693_v57  ;;  %814 = vmatmul.bf16.vlgmr.msrb.gmra.mxu2 %v1689_v54 }
  0xa1   : > { %828 = vmatmul.bf16.vlgmr.msrb.gmra.mxu3 %v1693_v57 }
  0xfc   : > { %v731_v8 = vpop.f32.mrf.mxu0 }
  0xff   : > { %v745_v9 = vpop.f32.mrf.mxu1 }
 0x100   : > { %v746_v10 = vadd.f32 %v745_v9, %v731_v8 }
 0x102   : > { %834 = vst [vmem:[%s1753_s17] sm:$0xff] %v746_v10 }
 0x103   : > { %v759_v11 = vpop.f32.mrf.mxu2 }
 0x104   : > { %v733_v14 = vpop.f32.mrf.mxu0 }
 0x106   : > { %v773_v12 = vpop.f32.mrf.mxu3 }
 0x107   : > { %v774_v13 = vadd.f32 %v773_v12, %v759_v11  ;;  %v747_v54 = vpop.f32.mrf.mxu1 }
 0x108   : > { %v748_v57 = vadd.f32 %v747_v54, %v733_v14 }
 0x109   : > { %835 = vst [vmem:[%s1753_s17 + $0x8] sm:$0xff] %v774_v13  ;;  %v867_v30 = vld [vmem:[%s1753_s17] sm:$0xff] (%p1447_p6) }
 0x10a   : > { %838 = vst [vmem:[%s1753_s17 + $0x20] sm:$0xff] %v748_v57 }
 0x10b   : > { %v761_v15 = vpop.f32.mrf.mxu2  ;;  %868 = vst [vmem:[%s854_s22] sm:$0xff] (%p1447_p6), %v867_v30 }
 0x10e   : > { %v775_v16 = vpop.f32.mrf.mxu3 }
 0x10f   : > { %v776_v17 = vadd.f32 %v775_v16, %v761_v15 }
 0x110   : > { %v869_v31 = vld [vmem:[%s1753_s17 + $0x8] sm:$0xff] (%p1447_p6) }
 0x111   : > { %839 = vst [vmem:[%s1753_s17 + $0x28] sm:$0xff] %v776_v17  ;;  %v875_v34 = vld [vmem:[%s1753_s17 + $0x20] sm:$0xff] (%p1447_p6) }
 0x112   : > { %870 = vst [vmem:[%s854_s22 + $0x8] sm:$0xff] (%p1447_p6), %v869_v31 }
 0x113   : > { %876 = vst [vmem:[%s854_s22 + $0x40] sm:$0xff] (%p1447_p6), %v875_v34 }
 0x118   : > { %v877_v35 = vld [vmem:[%s1753_s17 + $0x28] sm:$0xff] (%p1447_p6) }
 0x119   : > { %878 = vst [vmem:[%s854_s22 + $0x48] sm:$0xff] (%p1447_p6), %v877_v35 }
 0x11c   : > { %v787_v18 = vpop.f32.mrf.mxu0 }
 0x11d   : > { %v801_v19 = vpop.f32.mrf.mxu1 }
 0x11e   : > { %v802_v20 = vadd.f32 %v801_v19, %v787_v18 }
 0x120   : > { %836 = vst [vmem:[%s1753_s17 + $0x10] sm:$0xff] %v802_v20 }
 0x123   : > { %v815_v21 = vpop.f32.mrf.mxu2 }
 0x124   : > { %v829_v22 = vpop.f32.mrf.mxu3  ;;  %v789_v23 = vpop.f32.mrf.mxu0 }
 0x125   : > { %v830_v24 = vadd.f32 %v829_v22, %v815_v21  ;;  %v803_v25 = vpop.f32.mrf.mxu1 }
 0x126   : > { %v804_v26 = vadd.f32 %v803_v25, %v789_v23 }
 0x127   : > { %837 = vst [vmem:[%s1753_s17 + $0x18] sm:$0xff] %v830_v24  ;;  %v871_v32 = vld [vmem:[%s1753_s17 + $0x10] sm:$0xff] (%p1447_p6) }
 0x128   : > { %840 = vst [vmem:[%s1753_s17 + $0x30] sm:$0xff] %v804_v26 }
 0x129   : > { %872 = vst [vmem:[%s854_s22 + $0x10] sm:$0xff] (%p1447_p6), %v871_v32 }
 0x12b   : > { %v817_v27 = vpop.f32.mrf.mxu2  ;;  %848 = sbr.rel (!%p1447_p6) target bundleno = 312 (0x138), region = 55 }
 0x12c   : > { %v831_v28 = vpop.f32.mrf.mxu3 }
 0x12d   : > { %v832_v29 = vadd.f32 %v831_v28, %v817_v27 }
 0x12e   : > { %v873_v33 = vld [vmem:[%s1753_s17 + $0x18] sm:$0xff] (%p1447_p6) }
 0x12f   : > { %841 = vst [vmem:[%s1753_s17 + $0x38] sm:$0xff] %v832_v29  ;;  %v879_v36 = vld [vmem:[%s1753_s17 + $0x30] sm:$0xff] (%p1447_p6) }
 0x130   : > { %874 = vst [vmem:[%s854_s22 + $0x18] sm:$0xff] %v873_v33 }
 0x131   : > { %880 = vst [vmem:[%s854_s22 + $0x50] sm:$0xff] %v879_v36 }
 0x136   : > { %v881_v37 = vld [vmem:[%s1753_s17 + $0x38] sm:$0xff] }
 0x137   : > { %882 = vst [vmem:[%s854_s22 + $0x58] sm:$0xff] %v881_v37 }
 0x138 PF: > { %s12_s13 = sadd.s32 1, %s1395_s13   ;;  %s1796_s9 = smov %s1383_s10 }
 0x139   : > { %p9_p11 = scmp.ge.s32.totalorder %s12_s13, 4   ;;  %s1797_s10 = smov %s1452_s19 }
 0x13a   : > { %s1798_s11 = smov %s1391_s12  ;;  %s1799_s12 = smov %s1801_s14 }
 0x13b   :  { %11 = sbr.rel (!%p9_p11) target bundleno = 3 (0x3), region = 112 }

</bundles_post_ra>
